<compile_context>
chip_gen: v6e
topology: v6e:2x2x1
jax: 0.10.0
libtpu: 0.0.40
codegen_flags: <defaults>
</compile_context>

<pallas_src>
import functools

import jax
import jax.numpy as jnp
from jax.experimental import pallas as pl
from jax.experimental.pallas import tpu as pltpu


def _round_up(n, m):
    return ((n + m - 1) // m) * m


def _fused_mlp_kernel(x_ref, w_ref, b_ref, o_ref, *, num_layers, residual_flags):
    """act = x; for each layer: y = GELU(act @ W[i] + b[i]); act = act + y or y."""
    c = jnp.float32(0.7978845608028654)  # sqrt(2/pi)

    act = x_ref[...].astype(jnp.float32)
    for i in range(num_layers):  # static unroll over the 5 layers
        w = w_ref[i]                        # (D_pad, D_pad) bf16; static slice is free
        b = b_ref[i].astype(jnp.float32)    # (1, D_pad) f32

        # Linear: bf16 x bf16 MXU matmul with f32 accumulation, f32 bias add.
        y = jnp.dot(act.astype(jnp.bfloat16), w,
                    preferred_element_type=jnp.float32) + b

        # GELU, tanh approximation (matches the custom GELU module):
        # 0.5 * y * (1 + tanh(sqrt(2/pi) * (y + 0.044715 * y^3)))
        # cubic factored as c * y * (1 + 0.044715 * y^2) to save a vmul.
        y = 0.5 * y * (1.0 + jnp.tanh(c * y * (1.0 + 0.044715 * (y * y))))

        # Residual shortcut (static decision, mirrors torch's shape equality).
        if residual_flags[i]:
            y = act + y
        act = y

    o_ref[...] = act.astype(o_ref.dtype)


def prepare_params(params, use_shortcut):
    """One-time packing: pad every (W, b) to a common 128-multiple width and
    stack into single slabs so the kernel sees 3 inputs instead of 11.

    Returns (w_all (L,Dp,Dp) bf16, b_all (L,1,Dp) f32, residual_flags, out_dim).
    """
    dims = [params[0][0].shape[0]] + [w.shape[1] for (w, _) in params]
    d_pad = _round_up(max(dims), 128)

    ws, bs, flags = [], [], []
    for (w, b) in params:
        din, dout = w.shape
        ws.append(jnp.pad(w, ((0, d_pad - din), (0, d_pad - dout)))
                  .astype(jnp.bfloat16))
        bs.append(jnp.pad(b, ((0, 0), (0, d_pad - dout))).astype(jnp.float32))
        # torch checks x.shape == layer_output.shape; batch is preserved by
        # Linear, so this reduces to din == dout (on the *unpadded* dims).
        flags.append(bool(use_shortcut) and din == dout)

    w_all = jnp.stack(ws)   # (L, d_pad, d_pad) bf16
    b_all = jnp.stack(bs)   # (L, 1, d_pad)    f32
    return w_all, b_all, tuple(flags), dims[-1]


@functools.partial(jax.jit, static_argnames=("residual_flags", "out_dim"))
def example_deep_neural_network(x, w_all, b_all, *, residual_flags, out_dim):
    """Forward pass equivalent to ExampleDeepNeuralNetwork.forward.

    x: (batch, din0) f32; w_all/b_all: pre-packed slabs from prepare_params.
    Single fused Pallas kernel; pad/slice fuse with neighbors under jit.
    """
    batch, din0 = x.shape
    num_layers, d_pad, _ = w_all.shape
    b_pad = _round_up(batch, 8)

    # Pad activation to (sublane, lane)-aligned shape. Zero pad is exact.
    x_p = jnp.pad(x, ((0, b_pad - batch), (0, d_pad - din0)))

    kernel = functools.partial(
        _fused_mlp_kernel,
        num_layers=num_layers,
        residual_flags=residual_flags,
    )

    out_p = pl.pallas_call(
        kernel,
        out_shape=jax.ShapeDtypeStruct((b_pad, d_pad), x.dtype),
        # Whole-array blocks: 3 small inputs + 1 output, all VMEM-resident for
        # the single fused invocation; no grid, no HBM intermediates.
        in_specs=[pl.BlockSpec(memory_space=pltpu.VMEM)] * 3,
        out_specs=pl.BlockSpec(memory_space=pltpu.VMEM),
    )(x_p, w_all, b_all)

    # Slice away the lane / sublane padding.
    return out_p[:batch, :out_dim]


def init_params(layer_sizes, key):
    """Deterministic init mimicking nn.Linear (uniform +-1/sqrt(fan_in))."""
    params = []
    for i in range(len(layer_sizes) - 1):
        din, dout = layer_sizes[i], layer_sizes[i + 1]
        key, kw, kb = jax.random.split(key, 3)
        bound = 1.0 / jnp.sqrt(jnp.float32(din))
        w = jax.random.uniform(kw, (din, dout), jnp.float32, -bound, bound)
        b = jax.random.uniform(kb, (1, dout), jnp.float32, -bound, bound)
        params.append((w, b))
    return params


def _reference_forward(x, params, use_shortcut):
    """Pure-JAX f32 reference matching the PyTorch module."""
    c = jnp.float32(0.7978845608028654)
    for (w, b) in params:
        y = x @ w + b
        y = 0.5 * y * (1.0 + jnp.tanh(c * (y + 0.044715 * y * y * y)))
        if use_shortcut and x.shape == y.shape:
            x = x + y
        else:
            x = y
    return x


if __name__ == "__main__":
    # 5 linear layers; first four preserve the width (shortcut fires),
    # last one shrinks it (shortcut skipped), like the book's [3,3,3,3,3,1].
    layer_sizes = [32, 32, 32, 32, 32, 16]
    batch = 8
    use_shortcut = True

    key = jax.random.PRNGKey(0)
    key, kx = jax.random.split(key)
    x = jax.random.normal(kx, (batch, layer_sizes[0]), jnp.float32)
    params = init_params(layer_sizes, key)

    # One-time packing of padded bf16 weights / f32 biases (hoisted from the
    # per-call path per the perf review).
    w_all, b_all, residual_flags, out_dim = prepare_params(params, use_shortcut)

    out = example_deep_neural_network(
        x, w_all, b_all, residual_flags=residual_flags, out_dim=out_dim)
    jax.block_until_ready(out)

    assert out.shape == (batch, layer_sizes[-1]), out.shape
    assert out.dtype == jnp.float32
    assert bool(jnp.all(jnp.isfinite(out)))

    # Reference is exact f32; kernel uses bf16 MXU operands (f32 accumulate),
    # so allow ~1e-2 — typical error at K=32 over 5 residual layers is a few
    # 1e-3.
    ref = _reference_forward(x, params, use_shortcut)
    max_err = float(jnp.max(jnp.abs(out - ref)))
    assert bool(jnp.allclose(out, ref, rtol=1e-2, atol=1e-2)), max_err

    print("KERNEL_OK")
</pallas_src>

<mosaic_0001>
module attributes {stable_mosaic.version = 11 : i64} {
  func.func @_fused_mlp_kernel(%arg0: memref<8x128xf32, #tpu.memory_space<vmem>>, %arg1: memref<5x128x128xbf16, #tpu.memory_space<vmem>>, %arg2: memref<5x1x128xf32, #tpu.memory_space<vmem>>, %arg3: memref<8x128xf32, #tpu.memory_space<vmem>>) attributes {dimension_semantics = [], scalar_prefetch = 0 : i64, scratch_operands = 0 : i64, tpu.core_type = #tpu.core_type<tc>} {
    %c0 = arith.constant 0 : index
    %c0_0 = arith.constant 0 : index
    %0 = vector.load %arg0[%c0, %c0_0] : memref<8x128xf32, #tpu.memory_space<vmem>>, vector<8x128xf32>
    %c0_1 = arith.constant 0 : index
    %c0_2 = arith.constant 0 : index
    %c0_3 = arith.constant 0 : index
    %1 = vector.load %arg1[%c0_1, %c0_2, %c0_3] : memref<5x128x128xbf16, #tpu.memory_space<vmem>>, vector<1x128x128xbf16>
    %2 = vector.shape_cast %1 : vector<1x128x128xbf16> to vector<128x128xbf16>
    %c0_4 = arith.constant 0 : index
    %c0_5 = arith.constant 0 : index
    %c0_6 = arith.constant 0 : index
    %3 = vector.load %arg2[%c0_4, %c0_5, %c0_6] : memref<5x1x128xf32, #tpu.memory_space<vmem>>, vector<1x1x128xf32>
    %4 = vector.shape_cast %3 : vector<1x1x128xf32> to vector<1x128xf32>
    %5 = arith.truncf %0 : vector<8x128xf32> to vector<8x128xbf16>
    %cst = arith.constant dense<0.000000e+00> : vector<8x128xf32>
    %6 = tpu.matmul %5, %2, %cst {dimension_numbers = #tpu.dot_dimension_numbers<[1], [0], [0], [1], [0, 0, 1, 1], [], []>} : vector<8x128xbf16>, vector<128x128xbf16>, vector<8x128xf32> -> vector<8x128xf32>
    %7 = vector.broadcast %4 : vector<1x128xf32> to vector<8x128xf32>
    %8 = arith.addf %6, %7 : vector<8x128xf32>
    %cst_7 = arith.constant 5.000000e-01 : f32
    %9 = vector.broadcast %cst_7 : f32 to vector<8x128xf32>
    %10 = arith.mulf %9, %8 : vector<8x128xf32>
    %cst_8 = arith.constant 0.797884583 : f32
    %11 = vector.broadcast %cst_8 : f32 to vector<8x128xf32>
    %12 = arith.mulf %11, %8 : vector<8x128xf32>
    %13 = arith.mulf %8, %8 : vector<8x128xf32>
    %cst_9 = arith.constant 4.471500e-02 : f32
    %14 = vector.broadcast %cst_9 : f32 to vector<8x128xf32>
    %15 = arith.mulf %14, %13 : vector<8x128xf32>
    %cst_10 = arith.constant 1.000000e+00 : f32
    %16 = vector.broadcast %cst_10 : f32 to vector<8x128xf32>
    %17 = arith.addf %16, %15 : vector<8x128xf32>
    %18 = arith.mulf %12, %17 : vector<8x128xf32>
    %19 = math.tanh %18 : vector<8x128xf32>
    %cst_11 = arith.constant 1.000000e+00 : f32
    %20 = vector.broadcast %cst_11 : f32 to vector<8x128xf32>
    %21 = arith.addf %20, %19 : vector<8x128xf32>
    %22 = arith.mulf %10, %21 : vector<8x128xf32>
    %23 = arith.addf %0, %22 : vector<8x128xf32>
    %c1 = arith.constant 1 : index
    %c0_12 = arith.constant 0 : index
    %c0_13 = arith.constant 0 : index
    %24 = vector.load %arg1[%c1, %c0_12, %c0_13] : memref<5x128x128xbf16, #tpu.memory_space<vmem>>, vector<1x128x128xbf16>
    %25 = vector.shape_cast %24 : vector<1x128x128xbf16> to vector<128x128xbf16>
    %c1_14 = arith.constant 1 : index
    %c0_15 = arith.constant 0 : index
    %c0_16 = arith.constant 0 : index
    %26 = vector.load %arg2[%c1_14, %c0_15, %c0_16] : memref<5x1x128xf32, #tpu.memory_space<vmem>>, vector<1x1x128xf32>
    %27 = vector.shape_cast %26 : vector<1x1x128xf32> to vector<1x128xf32>
    %28 = arith.truncf %23 : vector<8x128xf32> to vector<8x128xbf16>
    %cst_17 = arith.constant dense<0.000000e+00> : vector<8x128xf32>
    %29 = tpu.matmul %28, %25, %cst_17 {dimension_numbers = #tpu.dot_dimension_numbers<[1], [0], [0], [1], [0, 0, 1, 1], [], []>} : vector<8x128xbf16>, vector<128x128xbf16>, vector<8x128xf32> -> vector<8x128xf32>
    %30 = vector.broadcast %27 : vector<1x128xf32> to vector<8x128xf32>
    %31 = arith.addf %29, %30 : vector<8x128xf32>
    %cst_18 = arith.constant 5.000000e-01 : f32
    %32 = vector.broadcast %cst_18 : f32 to vector<8x128xf32>
    %33 = arith.mulf %32, %31 : vector<8x128xf32>
    %cst_19 = arith.constant 0.797884583 : f32
    %34 = vector.broadcast %cst_19 : f32 to vector<8x128xf32>
    %35 = arith.mulf %34, %31 : vector<8x128xf32>
    %36 = arith.mulf %31, %31 : vector<8x128xf32>
    %cst_20 = arith.constant 4.471500e-02 : f32
    %37 = vector.broadcast %cst_20 : f32 to vector<8x128xf32>
    %38 = arith.mulf %37, %36 : vector<8x128xf32>
    %cst_21 = arith.constant 1.000000e+00 : f32
    %39 = vector.broadcast %cst_21 : f32 to vector<8x128xf32>
    %40 = arith.addf %39, %38 : vector<8x128xf32>
    %41 = arith.mulf %35, %40 : vector<8x128xf32>
    %42 = math.tanh %41 : vector<8x128xf32>
    %cst_22 = arith.constant 1.000000e+00 : f32
    %43 = vector.broadcast %cst_22 : f32 to vector<8x128xf32>
    %44 = arith.addf %43, %42 : vector<8x128xf32>
    %45 = arith.mulf %33, %44 : vector<8x128xf32>
    %46 = arith.addf %23, %45 : vector<8x128xf32>
    %c2 = arith.constant 2 : index
    %c0_23 = arith.constant 0 : index
    %c0_24 = arith.constant 0 : index
    %47 = vector.load %arg1[%c2, %c0_23, %c0_24] : memref<5x128x128xbf16, #tpu.memory_space<vmem>>, vector<1x128x128xbf16>
    %48 = vector.shape_cast %47 : vector<1x128x128xbf16> to vector<128x128xbf16>
    %c2_25 = arith.constant 2 : index
    %c0_26 = arith.constant 0 : index
    %c0_27 = arith.constant 0 : index
    %49 = vector.load %arg2[%c2_25, %c0_26, %c0_27] : memref<5x1x128xf32, #tpu.memory_space<vmem>>, vector<1x1x128xf32>
    %50 = vector.shape_cast %49 : vector<1x1x128xf32> to vector<1x128xf32>
    %51 = arith.truncf %46 : vector<8x128xf32> to vector<8x128xbf16>
    %cst_28 = arith.constant dense<0.000000e+00> : vector<8x128xf32>
    %52 = tpu.matmul %51, %48, %cst_28 {dimension_numbers = #tpu.dot_dimension_numbers<[1], [0], [0], [1], [0, 0, 1, 1], [], []>} : vector<8x128xbf16>, vector<128x128xbf16>, vector<8x128xf32> -> vector<8x128xf32>
    %53 = vector.broadcast %50 : vector<1x128xf32> to vector<8x128xf32>
    %54 = arith.addf %52, %53 : vector<8x128xf32>
    %cst_29 = arith.constant 5.000000e-01 : f32
    %55 = vector.broadcast %cst_29 : f32 to vector<8x128xf32>
    %56 = arith.mulf %55, %54 : vector<8x128xf32>
    %cst_30 = arith.constant 0.797884583 : f32
    %57 = vector.broadcast %cst_30 : f32 to vector<8x128xf32>
    %58 = arith.mulf %57, %54 : vector<8x128xf32>
    %59 = arith.mulf %54, %54 : vector<8x128xf32>
    %cst_31 = arith.constant 4.471500e-02 : f32
    %60 = vector.broadcast %cst_31 : f32 to vector<8x128xf32>
    %61 = arith.mulf %60, %59 : vector<8x128xf32>
    %cst_32 = arith.constant 1.000000e+00 : f32
    %62 = vector.broadcast %cst_32 : f32 to vector<8x128xf32>
    %63 = arith.addf %62, %61 : vector<8x128xf32>
    %64 = arith.mulf %58, %63 : vector<8x128xf32>
    %65 = math.tanh %64 : vector<8x128xf32>
    %cst_33 = arith.constant 1.000000e+00 : f32
    %66 = vector.broadcast %cst_33 : f32 to vector<8x128xf32>
    %67 = arith.addf %66, %65 : vector<8x128xf32>
    %68 = arith.mulf %56, %67 : vector<8x128xf32>
    %69 = arith.addf %46, %68 : vector<8x128xf32>
    %c3 = arith.constant 3 : index
    %c0_34 = arith.constant 0 : index
    %c0_35 = arith.constant 0 : index
    %70 = vector.load %arg1[%c3, %c0_34, %c0_35] : memref<5x128x128xbf16, #tpu.memory_space<vmem>>, vector<1x128x128xbf16>
    %71 = vector.shape_cast %70 : vector<1x128x128xbf16> to vector<128x128xbf16>
    %c3_36 = arith.constant 3 : index
    %c0_37 = arith.constant 0 : index
    %c0_38 = arith.constant 0 : index
    %72 = vector.load %arg2[%c3_36, %c0_37, %c0_38] : memref<5x1x128xf32, #tpu.memory_space<vmem>>, vector<1x1x128xf32>
    %73 = vector.shape_cast %72 : vector<1x1x128xf32> to vector<1x128xf32>
    %74 = arith.truncf %69 : vector<8x128xf32> to vector<8x128xbf16>
    %cst_39 = arith.constant dense<0.000000e+00> : vector<8x128xf32>
    %75 = tpu.matmul %74, %71, %cst_39 {dimension_numbers = #tpu.dot_dimension_numbers<[1], [0], [0], [1], [0, 0, 1, 1], [], []>} : vector<8x128xbf16>, vector<128x128xbf16>, vector<8x128xf32> -> vector<8x128xf32>
    %76 = vector.broadcast %73 : vector<1x128xf32> to vector<8x128xf32>
    %77 = arith.addf %75, %76 : vector<8x128xf32>
    %cst_40 = arith.constant 5.000000e-01 : f32
    %78 = vector.broadcast %cst_40 : f32 to vector<8x128xf32>
    %79 = arith.mulf %78, %77 : vector<8x128xf32>
    %cst_41 = arith.constant 0.797884583 : f32
    %80 = vector.broadcast %cst_41 : f32 to vector<8x128xf32>
    %81 = arith.mulf %80, %77 : vector<8x128xf32>
    %82 = arith.mulf %77, %77 : vector<8x128xf32>
    %cst_42 = arith.constant 4.471500e-02 : f32
    %83 = vector.broadcast %cst_42 : f32 to vector<8x128xf32>
    %84 = arith.mulf %83, %82 : vector<8x128xf32>
    %cst_43 = arith.constant 1.000000e+00 : f32
    %85 = vector.broadcast %cst_43 : f32 to vector<8x128xf32>
    %86 = arith.addf %85, %84 : vector<8x128xf32>
    %87 = arith.mulf %81, %86 : vector<8x128xf32>
    %88 = math.tanh %87 : vector<8x128xf32>
    %cst_44 = arith.constant 1.000000e+00 : f32
    %89 = vector.broadcast %cst_44 : f32 to vector<8x128xf32>
    %90 = arith.addf %89, %88 : vector<8x128xf32>
    %91 = arith.mulf %79, %90 : vector<8x128xf32>
    %92 = arith.addf %69, %91 : vector<8x128xf32>
    %c4 = arith.constant 4 : index
    %c0_45 = arith.constant 0 : index
    %c0_46 = arith.constant 0 : index
    %93 = vector.load %arg1[%c4, %c0_45, %c0_46] : memref<5x128x128xbf16, #tpu.memory_space<vmem>>, vector<1x128x128xbf16>
    %94 = vector.shape_cast %93 : vector<1x128x128xbf16> to vector<128x128xbf16>
    %c4_47 = arith.constant 4 : index
    %c0_48 = arith.constant 0 : index
    %c0_49 = arith.constant 0 : index
    %95 = vector.load %arg2[%c4_47, %c0_48, %c0_49] : memref<5x1x128xf32, #tpu.memory_space<vmem>>, vector<1x1x128xf32>
    %96 = vector.shape_cast %95 : vector<1x1x128xf32> to vector<1x128xf32>
    %97 = arith.truncf %92 : vector<8x128xf32> to vector<8x128xbf16>
    %cst_50 = arith.constant dense<0.000000e+00> : vector<8x128xf32>
    %98 = tpu.matmul %97, %94, %cst_50 {dimension_numbers = #tpu.dot_dimension_numbers<[1], [0], [0], [1], [0, 0, 1, 1], [], []>} : vector<8x128xbf16>, vector<128x128xbf16>, vector<8x128xf32> -> vector<8x128xf32>
    %99 = vector.broadcast %96 : vector<1x128xf32> to vector<8x128xf32>
    %100 = arith.addf %98, %99 : vector<8x128xf32>
    %cst_51 = arith.constant 5.000000e-01 : f32
    %101 = vector.broadcast %cst_51 : f32 to vector<8x128xf32>
    %102 = arith.mulf %101, %100 : vector<8x128xf32>
    %cst_52 = arith.constant 0.797884583 : f32
    %103 = vector.broadcast %cst_52 : f32 to vector<8x128xf32>
    %104 = arith.mulf %103, %100 : vector<8x128xf32>
    %105 = arith.mulf %100, %100 : vector<8x128xf32>
    %cst_53 = arith.constant 4.471500e-02 : f32
    %106 = vector.broadcast %cst_53 : f32 to vector<8x128xf32>
    %107 = arith.mulf %106, %105 : vector<8x128xf32>
    %cst_54 = arith.constant 1.000000e+00 : f32
    %108 = vector.broadcast %cst_54 : f32 to vector<8x128xf32>
    %109 = arith.addf %108, %107 : vector<8x128xf32>
    %110 = arith.mulf %104, %109 : vector<8x128xf32>
    %111 = math.tanh %110 : vector<8x128xf32>
    %cst_55 = arith.constant 1.000000e+00 : f32
    %112 = vector.broadcast %cst_55 : f32 to vector<8x128xf32>
    %113 = arith.addf %112, %111 : vector<8x128xf32>
    %114 = arith.mulf %102, %113 : vector<8x128xf32>
    %c0_56 = arith.constant 0 : index
    %c0_57 = arith.constant 0 : index
    %115 = vector.load %arg3[%c0_56, %c0_57] : memref<8x128xf32, #tpu.memory_space<vmem>>, vector<8x128xf32>
    tpu.vector_store %arg3[%c0_56, %c0_57], %114 {strides = array<i32>} : memref<8x128xf32, #tpu.memory_space<vmem>>, vector<8x128xf32>,
    return
  }
}

</mosaic_0001>

<bundles_post_ra>
// kernel: example_deep_neural_network.1
= control target key start
LH: loop header
LB: loop body
LE: loop exit
PB: predicated region body
PF: predicated region fallthrough
CT: control target
= control target key end

     0   :  { %8 = vsyncpa [#allocation3], 0  ;;  %s1058_s0 = inlined_call_operand.vmem [shape: f32[8,128], index: 0, kind: input, shape index: {}]   ;;  %s1059_s1 = inlined_call_operand.hbm [shape: bf16[5,128,128], index: 1, kind: input, shape index: {}]   ;;  %s1060_s2 = inlined_call_operand.vmem [shape: f32[5,1,128], index: 2, kind: input, shape index: {}]   ;;  %s1061_s3 = inlined_call_operand.hbm [shape: f32[8,128], index: 3, kind: output, shape index: {}]  }
   0x1   :  { %9 = vsyncpa [#allocation4], 0  ;;  %s958_s12 = smov [#allocation2]  }
   0x2   :  { %s17_s13 = sshll.u32 %s958_s12, 4  ;;  %s18_s13 = int_to_ptr.vmem [resolvable:$true] %s17_s13 }
   0x3   :  { %s922_s14 = scalar_lea.vmem %s18_s13, 5120  ;;  %p927_p1 = scmp.lt.s32.totalorder %s18_s13, %s18_s13 }
   0x4   :  { %p923_p0 = scmp.ne.s32.totalorder %s18_s13, %s922_s14  ;;  %p928_p2 = scmp.lt.s32.totalorder %s922_s14, %s922_s14 }
   0x6   :  { %p929_p3 = por %p928_p2, %p927_p1 }
   0x8   :  { %p930_p4 = pnand %p929_p3, %p923_p0 }
   0xa   :  { %933 = shalt.err (!%p930_p4)
}
   0xb   :  { %s959_s15 = smov 64   ;;  %s960_s16 = smov 4  }
   0xc   :  { %23 = dma.hbm_to_vmem [thread:$0]  %s1059_s1, 5120, %s18_s13, [#allocation3], %s959_s15, %s959_s15, %s960_s16  }
   0xd   :  { %954 = dma.done.wait [#allocation3], 5120  }
   0xe   :  { %955 = vsyncadd [#allocation3], 4294962176  ;;  %v961_v0 = vmov 0.0   ;;  %vm962_vm0 = vmmov 0   ;;  %v864_v1 = vld [vmem:[#allocation2 + $0x38] sm:$0xff]   ;;  %v865_v2 = vld [vmem:[#allocation2 + $0x30] sm:$0xff]  }
   0xf   :  { %758 = vmatprep.subr.bf16.mxu0 %v961_v0  ;;  %774 = vmatprep.mubr.msk.bf16.mxu0 %vm962_vm0, %v961_v0  ;;  %v866_v3 = vld [vmem:[#allocation2 + $0x28] sm:$0xff]   ;;  %v867_v4 = vld [vmem:[#allocation2 + $0x20] sm:$0xff]   ;;  %v868_v5 = vld [vmem:[#allocation2 + $0x18] sm:$0xff]   ;;  %s963_s29 = smov [#allocation5]  }
  0x10   :  { %778 = vmatprep.subr.bf16.mxu1 %v961_v0  ;;  %794 = vmatprep.mubr.msk.bf16.mxu1 %vm962_vm0, %v961_v0  ;;  %v869_v6 = vld [vmem:[#allocation2 + $0x10] sm:$0xff]   ;;  %v870_v7 = vld [vmem:[#allocation2 + $0x8] sm:$0xff]   ;;  %v871_v8 = vld [vmem:[#allocation2] sm:$0xff]   ;;  %s655_s30 = sshll.u32 %s963_s29, 4  ;;  %s656_s30 = int_to_ptr.vmem [resolvable:$true] %s655_s30 }
  0x11   :  { %759 = vmatpush3.bf16.msra.mxu0 %v864_v1  ;;  %v30_v9 = vld [vmem:[%s1058_s0] sm:$0xff]  ;;  %v872_v11 = vld [vmem:[#allocation2 + $0x78] sm:$0xff]   ;;  %v873_v12 = vld [vmem:[#allocation2 + $0x70] sm:$0xff]   ;;  %p939_p6 = scmp.lt.s32.totalorder %s656_s30, %s656_s30 }
  0x12   :  { %760 = vmatprep.subr.bf16.mxu0 %v961_v0  ;;  %v48_v10 = vpack.c.bf16 %v30_v9, %v30_v9  ;;  %779 = vmatpush3.bf16.msra.mxu1 %v872_v11  ;;  %v874_v13 = vld [vmem:[#allocation2 + $0x68] sm:$0xff]   ;;  %v875_v14 = vld [vmem:[#allocation2 + $0x60] sm:$0xff]   ;;  %v876_v15 = vld [vmem:[#allocation2 + $0x58] sm:$0xff]  }
  0x13   :  { %780 = vmatprep.subr.bf16.mxu1 %v961_v0  ;;  %v877_v16 = vld [vmem:[#allocation2 + $0x50] sm:$0xff]   ;;  %v878_v17 = vld [vmem:[#allocation2 + $0x48] sm:$0xff]   ;;  %v879_v18 = vld [vmem:[#allocation2 + $0x40] sm:$0xff]  }
  0x14   :  { %v664_v19 = vld [vmem:[%s1060_s2] ss:$0 sm:$0xff]  ;;  %v880_v36 = vld [vmem:[#allocation2 + $0xb8] sm:$0xff]   ;;  %v881_v37 = vld [vmem:[#allocation2 + $0xb0] sm:$0xff]  }
  0x15   :  { %761 = vmatpush3.bf16.msra.mxu0 %v865_v2  ;;  %v882_v38 = vld [vmem:[#allocation2 + $0xa8] sm:$0xff]   ;;  %v883_v39 = vld [vmem:[#allocation2 + $0xa0] sm:$0xff]   ;;  %v884_v40 = vld [vmem:[#allocation2 + $0x98] sm:$0xff]  }
  0x16   :  { %762 = vmatprep.subr.bf16.mxu0 %v961_v0  ;;  %781 = vmatpush3.bf16.msra.mxu1 %v873_v12  ;;  %v885_v41 = vld [vmem:[#allocation2 + $0x90] sm:$0xff]   ;;  %v886_v42 = vld [vmem:[#allocation2 + $0x88] sm:$0xff]   ;;  %v887_v43 = vld [vmem:[#allocation2 + $0x80] sm:$0xff]  }
  0x17   :  { %782 = vmatprep.subr.bf16.mxu1 %v961_v0  ;;  %v674_v44 = vld [vmem:[%s1060_s2 + $0x1] ss:$0 sm:$0xff]  ;;  %v888_v61 = vld [vmem:[#allocation2 + $0xf8] sm:$0xff]   ;;  %v889_v62 = vld [vmem:[#allocation2 + $0xf0] sm:$0xff]  }
  0x18   :  { %v890_v63 = vld [vmem:[#allocation2 + $0xe8] sm:$0xff]   ;;  %v891_v1 = vld [vmem:[#allocation2 + $0xe0] sm:$0xff]   ;;  %v892_v2 = vld [vmem:[#allocation2 + $0xd8] sm:$0xff]  }
  0x19   :  { %763 = vmatpush3.bf16.msra.mxu0 %v866_v3  ;;  %v893_v3 = vld [vmem:[#allocation2 + $0xd0] sm:$0xff]  }
  0x1a   :  { %764 = vmatprep.subr.bf16.mxu0 %v961_v0  ;;  %783 = vmatpush3.bf16.msra.mxu1 %v874_v13 }
  0x1b   :  { %784 = vmatprep.subr.bf16.mxu1 %v961_v0 }
  0x1d   :  { %765 = vmatpush3.bf16.msra.mxu0 %v867_v4  ;;  %v894_v4 = vld [vmem:[#allocation2 + $0xc8] sm:$0xff]  }
  0x1e   :  { %766 = vmatprep.subr.bf16.mxu0 %v961_v0  ;;  %785 = vmatpush3.bf16.msra.mxu1 %v875_v14 }
  0x1f   :  { %786 = vmatprep.subr.bf16.mxu1 %v961_v0 }
  0x21   :  { %767 = vmatpush3.bf16.msra.mxu0 %v868_v5  ;;  %v895_v5 = vld [vmem:[#allocation2 + $0xc0] sm:$0xff]  }
  0x22   :  { %768 = vmatprep.subr.bf16.mxu0 %v961_v0  ;;  %787 = vmatpush3.bf16.msra.mxu1 %v876_v15 }
  0x23   :  { %788 = vmatprep.subr.bf16.mxu1 %v961_v0 }
  0x25   :  { %769 = vmatpush3.bf16.msra.mxu0 %v869_v6  ;;  %v684_v6 = vld [vmem:[%s1060_s2 + $0x2] ss:$0 sm:$0xff] }
  0x26   :  { %770 = vmatprep.subr.bf16.mxu0 %v961_v0  ;;  %789 = vmatpush3.bf16.msra.mxu1 %v877_v16 }
  0x27   :  { %790 = vmatprep.subr.bf16.mxu1 %v961_v0 }
  0x29   :  { %771 = vmatpush3.bf16.msra.mxu0 %v870_v7 }
  0x2a   :  { %772 = vmatprep.subr.bf16.mxu0 %v961_v0  ;;  %791 = vmatpush3.bf16.msra.mxu1 %v878_v17 }
  0x2b   :  { %792 = vmatprep.subr.bf16.mxu1 %v961_v0 }
  0x2d   :  { %773 = vmatpush3.bf16.msra.mxu0 %v871_v8 }
  0x2e   :  { %798 = vmatprep.subr.bf16.mxu0 %v961_v0  ;;  %793 = vmatpush3.bf16.msra.mxu1 %v879_v18 }
  0x2f   :  { %818 = vmatprep.subr.bf16.mxu1 %v961_v0 }
  0x30   :  { %775 = vmatmul.mubr.bf16.vlgmr.msra.gmra.mxu0 %v48_v10 }
  0x31   :  { %814 = vmatprep.mubr.msk.bf16.mxu0 %vm962_vm0, %v961_v0  ;;  %799 = vmatpush3.bf16.msra.mxu0 %v880_v36 }
  0x32   :  { %800 = vmatprep.subr.bf16.mxu0 %v961_v0 }
  0x35   :  { %801 = vmatpush3.bf16.msra.mxu0 %v881_v37 }
  0x36   :  { %802 = vmatprep.subr.bf16.mxu0 %v961_v0 }
  0x39   :  { %803 = vmatpush3.bf16.msra.mxu0 %v882_v38 }
  0x3a   :  { %804 = vmatprep.subr.bf16.mxu0 %v961_v0 }
  0x3d   :  { %805 = vmatpush3.bf16.msra.mxu0 %v883_v39 }
  0x3e   :  { %806 = vmatprep.subr.bf16.mxu0 %v961_v0 }
  0x41   :  { %807 = vmatpush3.bf16.msra.mxu0 %v884_v40 }
  0x42   :  { %808 = vmatprep.subr.bf16.mxu0 %v961_v0 }
  0x45   :  { %809 = vmatpush3.bf16.msra.mxu0 %v885_v41 }
  0x46   :  { %810 = vmatprep.subr.bf16.mxu0 %v961_v0 }
  0x49   :  { %811 = vmatpush3.bf16.msra.mxu0 %v886_v42 }
  0x4a   :  { %812 = vmatprep.subr.bf16.mxu0 %v961_v0 }
  0x4d   :  { %813 = vmatpush3.bf16.msra.mxu0 %v887_v43 }
  0x4e   :  { %838 = vmatprep.subr.bf16.mxu0 %v961_v0 }
  0xf0   :  { %v137_v20 = vpop.f32.mrf.mxu0 }
  0xf1   :  { %v138_v21 = vadd.f32 %v664_v19, %v137_v20 }
  0xf2   :  { %v776_v22 = vpop.f32.mrf.mxu0 }
  0xf3   :  { %v145_v23 = vmul.f32 %v138_v21, %v138_v21  ;;  %v144_v27 = vmul.f32 0.7978846, %v138_v21  ;;  %v143_v31 = vmul.f32 0.5, %v138_v21 }
  0xf4   :  { %v140_v24 = vpop.f32.mrf.mxu0 }
  0xf5   :  { %v146_v25 = vmul.f32 0.044715, %v145_v23  ;;  %v896_v23 = vld [vmem:[#allocation2 + $0x138] sm:$0xff]   ;;  %v897_v24 = vld [vmem:[#allocation2 + $0x130] sm:$0xff]  }
  0xf6   :  { %v777_v26 = vpop.f32.mrf.mxu0 }
  0xf7   :  { %v147_v28 = vadd.f32 1.0, %v146_v25  ;;  %v898_v25 = vld [vmem:[#allocation2 + $0x128] sm:$0xff]   ;;  %v899_v26 = vld [vmem:[#allocation2 + $0x120] sm:$0xff]  }
  0xf9   :  { %v148_v29 = vmul.f32 %v147_v28, %v144_v27  ;;  %v900_v27 = vld [vmem:[#allocation2 + $0x118] sm:$0xff]   ;;  %v901_v28 = vld [vmem:[#allocation2 + $0x110] sm:$0xff]  }
  0xfb   :  { %904 = vtanh.f32 %v148_v29  ;;  %v902_v29 = vld [vmem:[#allocation2 + $0x108] sm:$0xff]  }
 0x108   :  { %v905_v30 = vpop.eup %904 }
 0x109   :  { %v150_v32 = vadd.f32 1.0, %v905_v30  ;;  %v903_v30 = vld [vmem:[#allocation2 + $0x100] sm:$0xff]  }
 0x10b   :  { %v151_v33 = vmul.f32 %v150_v32, %v143_v31  ;;  %v694_v31 = vld [vmem:[%s1060_s2 + $0x3] ss:$0 sm:$0xff] }
 0x10d   :  { %v152_v34 = vadd.f32 %v151_v33, %v30_v9 }
 0x10f   :  { %v172_v35 = vpack.c.bf16 %v152_v34, %v152_v34 }
 0x111   :  { %795 = vmatmul.mubr.bf16.vlgmr.msra.gmra.mxu1 %v172_v35 }
 0x112   :  { %834 = vmatprep.mubr.msk.bf16.mxu1 %vm962_vm0, %v961_v0  ;;  %819 = vmatpush3.bf16.msra.mxu1 %v888_v61 }
 0x113   :  { %820 = vmatprep.subr.bf16.mxu1 %v961_v0 }
 0x116   :  { %821 = vmatpush3.bf16.msra.mxu1 %v889_v62 }
 0x117   :  { %822 = vmatprep.subr.bf16.mxu1 %v961_v0 }
 0x11a   :  { %823 = vmatpush3.bf16.msra.mxu1 %v890_v63 }
 0x11b   :  { %824 = vmatprep.subr.bf16.mxu1 %v961_v0 }
 0x11e   :  { %825 = vmatpush3.bf16.msra.mxu1 %v891_v1 }
 0x11f   :  { %826 = vmatprep.subr.bf16.mxu1 %v961_v0 }
 0x122   :  { %827 = vmatpush3.bf16.msra.mxu1 %v892_v2 }
 0x123   :  { %828 = vmatprep.subr.bf16.mxu1 %v961_v0 }
 0x126   :  { %829 = vmatpush3.bf16.msra.mxu1 %v893_v3 }
 0x127   :  { %830 = vmatprep.subr.bf16.mxu1 %v961_v0 }
 0x12a   :  { %831 = vmatpush3.bf16.msra.mxu1 %v894_v4 }
 0x12b   :  { %832 = vmatprep.subr.bf16.mxu1 %v961_v0 }
 0x12e   :  { %833 = vmatpush3.bf16.msra.mxu1 %v895_v5 }
 0x1d1   :  { %v261_v45 = vpop.f32.mrf.mxu1 }
 0x1d2   :  { %v262_v46 = vadd.f32 %v674_v44, %v261_v45 }
 0x1d3   :  { %v796_v47 = vpop.f32.mrf.mxu1 }
 0x1d4   :  { %v269_v48 = vmul.f32 %v262_v46, %v262_v46  ;;  %v268_v52 = vmul.f32 0.7978846, %v262_v46  ;;  %v267_v56 = vmul.f32 0.5, %v262_v46  ;;  %v704_v47 = vld [vmem:[%s1060_s2 + $0x4] ss:$0 sm:$0xff]  ;;  %s934_s2 = scalar_lea.vmem %s656_s30, 128 }
 0x1d5   :  { %v264_v49 = vpop.f32.mrf.mxu1  ;;  %p935_p5 = scmp.ne.s32.totalorder %s656_s30, %s934_s2  ;;  %p940_p7 = scmp.lt.s32.totalorder %s934_s2, %s934_s2 }
 0x1d6   :  { %v270_v50 = vmul.f32 0.044715, %v269_v48 }
 0x1d7   :  { %v797_v51 = vpop.f32.mrf.mxu1  ;;  %p941_p8 = por %p940_p7, %p939_p6 }
 0x1d8   :  { %v271_v53 = vadd.f32 1.0, %v270_v50 }
 0x1d9   :  { %p942_p9 = pnand %p941_p8, %p935_p5 }
 0x1da   :  { %v272_v54 = vmul.f32 %v271_v53, %v268_v52 }
 0x1dc   :  { %906 = vtanh.f32 %v272_v54 }
 0x1e9   :  { %v907_v55 = vpop.eup %906 }
 0x1ea   :  { %v274_v57 = vadd.f32 1.0, %v907_v55 }
 0x1ec   :  { %v275_v58 = vmul.f32 %v274_v57, %v267_v56 }
 0x1ee   :  { %v276_v59 = vadd.f32 %v275_v58, %v152_v34 }
 0x1f0   :  { %v296_v60 = vpack.c.bf16 %v276_v59, %v276_v59 }
 0x1f2   :  { %815 = vmatmul.mubr.bf16.vlgmr.msra.gmra.mxu0 %v296_v60 }
 0x1f3   :  { %854 = vmatprep.mubr.msk.bf16.mxu0 %vm962_vm0, %v961_v0  ;;  %839 = vmatpush3.bf16.msra.mxu0 %v896_v23 }
 0x1f4   :  { %840 = vmatprep.subr.bf16.mxu0 %v961_v0 }
 0x1f7   :  { %841 = vmatpush3.bf16.msra.mxu0 %v897_v24 }
 0x1f8   :  { %842 = vmatprep.subr.bf16.mxu0 %v961_v0 }
 0x1fb   :  { %843 = vmatpush3.bf16.msra.mxu0 %v898_v25 }
 0x1fc   :  { %844 = vmatprep.subr.bf16.mxu0 %v961_v0 }
 0x1ff   :  { %845 = vmatpush3.bf16.msra.mxu0 %v899_v26 }
 0x200   :  { %846 = vmatprep.subr.bf16.mxu0 %v961_v0 }
 0x203   :  { %847 = vmatpush3.bf16.msra.mxu0 %v900_v27 }
 0x204   :  { %848 = vmatprep.subr.bf16.mxu0 %v961_v0 }
 0x207   :  { %849 = vmatpush3.bf16.msra.mxu0 %v901_v28 }
 0x208   :  { %850 = vmatprep.subr.bf16.mxu0 %v961_v0 }
 0x20b   :  { %851 = vmatpush3.bf16.msra.mxu0 %v902_v29 }
 0x20c   :  { %852 = vmatprep.subr.bf16.mxu0 %v961_v0 }
 0x20f   :  { %853 = vmatpush3.bf16.msra.mxu0 %v903_v30 }
 0x2b2   :  { %v385_v7 = vpop.f32.mrf.mxu0 }
 0x2b3   :  { %v386_v8 = vadd.f32 %v684_v6, %v385_v7 }
 0x2b4   :  { %v816_v9 = vpop.f32.mrf.mxu0 }
 0x2b5   :  { %v393_v10 = vmul.f32 %v386_v8, %v386_v8  ;;  %v392_v14 = vmul.f32 0.7978846, %v386_v8  ;;  %v391_v18 = vmul.f32 0.5, %v386_v8 }
 0x2b6   :  { %v388_v11 = vpop.f32.mrf.mxu0 }
 0x2b7   :  { %v394_v12 = vmul.f32 0.044715, %v393_v10 }
 0x2b8   :  { %v817_v13 = vpop.f32.mrf.mxu0 }
 0x2b9   :  { %v395_v15 = vadd.f32 1.0, %v394_v12 }
 0x2bb   :  { %v396_v16 = vmul.f32 %v395_v15, %v392_v14 }
 0x2bd   :  { %908 = vtanh.f32 %v396_v16 }
 0x2ca   :  { %v909_v17 = vpop.eup %908 }
 0x2cb   :  { %v398_v19 = vadd.f32 1.0, %v909_v17 }
 0x2cd   :  { %v399_v20 = vmul.f32 %v398_v19, %v391_v18 }
 0x2cf   :  { %v400_v21 = vadd.f32 %v399_v20, %v276_v59 }
 0x2d1   :  { %v420_v22 = vpack.c.bf16 %v400_v21, %v400_v21 }
 0x2d3   :  { %835 = vmatmul.mubr.bf16.vlgmr.msra.gmra.mxu1 %v420_v22 }
 0x393   :  { %v509_v32 = vpop.f32.mrf.mxu1 }
 0x394   :  { %v510_v33 = vadd.f32 %v694_v31, %v509_v32 }
 0x395   :  { %v836_v34 = vpop.f32.mrf.mxu1 }
 0x396   :  { %v517_v35 = vmul.f32 %v510_v33, %v510_v33  ;;  %v516_v39 = vmul.f32 0.7978846, %v510_v33  ;;  %v515_v43 = vmul.f32 0.5, %v510_v33 }
 0x397   :  { %v512_v36 = vpop.f32.mrf.mxu1 }
 0x398   :  { %v518_v37 = vmul.f32 0.044715, %v517_v35 }
 0x399   :  { %v837_v38 = vpop.f32.mrf.mxu1 }
 0x39a   :  { %v519_v40 = vadd.f32 1.0, %v518_v37 }
 0x39c   :  { %v520_v41 = vmul.f32 %v519_v40, %v516_v39 }
 0x39e   :  { %910 = vtanh.f32 %v520_v41 }
 0x3ab   :  { %v911_v42 = vpop.eup %910 }
 0x3ac   :  { %v522_v0 = vadd.f32 1.0, %v911_v42 }
 0x3ae   :  { %v523_v44 = vmul.f32 %v522_v0, %v515_v43 }
 0x3b0   :  { %v524_v45 = vadd.f32 %v523_v44, %v400_v21 }
 0x3b2   :  { %v544_v46 = vpack.c.bf16 %v524_v45, %v524_v45 }
 0x3b4   :  { %855 = vmatmul.mubr.bf16.vlgmr.msra.gmra.mxu0 %v544_v46 }
 0x474   :  { %v633_v48 = vpop.f32.mrf.mxu0 }
 0x475   :  { %v634_v49 = vadd.f32 %v704_v47, %v633_v48 }
 0x476   :  { %v856_v50 = vpop.f32.mrf.mxu0 }
 0x477   :  { %v641_v51 = vmul.f32 %v634_v49, %v634_v49  ;;  %v640_v55 = vmul.f32 0.7978846, %v634_v49  ;;  %v639_v59 = vmul.f32 0.5, %v634_v49 }
 0x478   :  { %v636_v52 = vpop.f32.mrf.mxu0 }
 0x479   :  { %v642_v53 = vmul.f32 0.044715, %v641_v51 }
 0x47a   :  { %v857_v54 = vpop.f32.mrf.mxu0 }
 0x47b   :  { %v643_v56 = vadd.f32 1.0, %v642_v53 }
 0x47d   :  { %v644_v57 = vmul.f32 %v643_v56, %v640_v55 }
 0x47f   :  { %912 = vtanh.f32 %v644_v57 }
 0x48c   :  { %v913_v58 = vpop.eup %912 }
 0x48d   :  { %v646_v60 = vadd.f32 1.0, %v913_v58 }
 0x48f   :  { %v647_v61 = vmul.f32 %v646_v60, %v639_v59 }
 0x491   :  { %648 = vst [vmem:[#allocation5] sm:$0xff] %v647_v61 }
 0x492   :  { %945 = shalt.err (!%p942_p9)
}
 0x493   :  { %658 = dma.vmem_to_hbm [thread:$0]  %s656_s30, 128, %s1061_s3, [#allocation4]  }
 0x494   :  { %956 = dma.done.wait [#allocation4], 128  }
 0x495   :  { %957 = vsyncadd [#allocation4], 4294967168 }
 0x496   :  { %662 = vsyncpa [#allocation3], 1 }
 0x497   :  { %663 = vsyncpa [#allocation4], 1 }

</bundles_post_ra>
